<compile_context>
chip_gen: v7x
topology: tpu7x:2x2x1
jax: 0.10.0
libtpu: 0.0.40
codegen_flags: <defaults>
</compile_context>

<pallas_src>
import numpy as np
import jax
import jax.numpy as jnp
from jax.experimental import pallas as pl
from jax.experimental.pallas import tpu as pltpu


# ------------------------------- kernel ------------------------------------


def _gfp_kernel(x_ref, w_ref, out_ref):
    # x_ref:   (tile_n, 1)        one noise level per row
    # w_ref:   (1, E_pad)         W * 2*pi, lane-padded
    # out_ref: (tile_n, 2*E_pad)  [sin(t) | cos(t)] with t = x * W * 2*pi
    e_pad = w_ref.shape[1]
    t = x_ref[...].astype(jnp.float32) * w_ref[...]          # (tile_n, E_pad)
    out_ref[:, :e_pad] = jnp.sin(t).astype(out_ref.dtype)    # lane-aligned store
    out_ref[:, e_pad:] = jnp.cos(t).astype(out_ref.dtype)    # lane-aligned store


# ------------------------------ helpers ------------------------------------


def _cdiv(a, b):
    return -(-a // b)


def _round_up(v, m):
    return _cdiv(v, m) * m


def _num_tensorcores():
    """Best-effort TC count per device (v5e/v6e -> 1, v7x -> 2). Heuristic only."""
    try:
        d = jax.devices()[0]
        if d.platform != "tpu":
            return 1
        n = getattr(d, "num_cores", None)
        if isinstance(n, int) and n > 0:
            return min(n, 2)
        kind = (getattr(d, "device_kind", "") or "").lower()
        if "v7" in kind:
            return 2
    except Exception:
        pass
    return 1


def _choose_tiling(n_rows, e_pad, out_itemsize, num_cores):
    """Pick (tile_n, num_steps); tile_n is a multiple of 8, fits VMEM budget."""
    n8 = _round_up(n_rows, 8)
    row_bytes = 2 * e_pad * out_itemsize
    vmem_budget = 4 << 20                      # per output buffer (x2 double-buffered)
    cap = min(1024, max(8, (vmem_budget // row_bytes) // 8 * 8))
    if num_cores <= 1:
        # v5e / v6e: one TensorCore -> fewest, largest steps.
        tile = min(n8, cap)
        return tile, _cdiv(n8, tile)
    # v7x-style megacore: even step count, ideally >= 2 steps per core.
    min_steps = 2 * num_cores if n8 >= 8 * 2 * num_cores else 2
    steps = max(min_steps, _round_up(_cdiv(n8, cap), 2))
    tile = min(cap, max(8, _round_up(_cdiv(n8, steps), 8)))
    steps = _round_up(_cdiv(n8, tile), 2)      # keep the step count even
    return tile, steps


# ------------------------------ wrapper ------------------------------------


def make_gaussian_fourier_projection(W, *, out_dtype=None, min_pallas_elems=1 << 16):
    """Factory: hoists the per-W preprocessing (2*pi fold, lane padding) out of
    the per-call path.  Returns a callable x -> (N, 2*E)."""
    W = jnp.asarray(W)
    E = W.shape[0]
    E_pad = _round_up(E, 128)

    # Fold 2*pi into W once; pad to a lane multiple. Padded lanes produce
    # sin(0)=0 / cos(0)=1 and are sliced off below.
    w2pi = W.astype(jnp.float32) * jnp.float32(2.0 * np.pi)
    w2pi_unpadded = w2pi
    if E_pad != E:
        w2pi = jnp.pad(w2pi, (0, E_pad - E))
    w_row = w2pi[None, :]                                      # (1, E_pad)

    num_cores = _num_tensorcores()

    def forward(x, *, force_pallas=False):
        if x.ndim == 2 and x.shape[-1] == 1:
            x = x[:, 0]
        assert x.ndim == 1, "x must be (N,) or (N, 1)"
        N = x.shape[0]
        dtype = x.dtype if out_dtype is None else out_dtype

        # Tiny problems: let XLA fuse sin/cos into downstream ops instead of
        # paying pallas_call fixed overhead + HBM materialization.
        if not force_pallas and N * 2 * E < min_pallas_elems:
            t = x.astype(jnp.float32)[:, None] * w2pi_unpadded[None, :]
            return jnp.concatenate([jnp.sin(t), jnp.cos(t)], axis=-1).astype(dtype)

        itemsize = jnp.dtype(dtype).itemsize
        tile_n, steps = _choose_tiling(N, E_pad, itemsize, num_cores)
        N_pad = tile_n * steps

        x32 = x.astype(jnp.float32)
        if N_pad != N:
            x32 = jnp.pad(x32, (0, N_pad - N))
        x2d = x32[:, None]                                     # (N_pad, 1)

        cost = pl.CostEstimate(
            flops=N_pad * E_pad,                               # the x*W multiply
            transcendentals=N_pad * 2 * E_pad,                 # sin + cos
            bytes_accessed=N_pad * 2 * E_pad * itemsize + N_pad * 4 + E_pad * 4,
        )

        out = pl.pallas_call(
            _gfp_kernel,
            out_shape=jax.ShapeDtypeStruct((N_pad, 2 * E_pad), dtype),
            grid_spec=pltpu.PrefetchScalarGridSpec(
                num_scalar_prefetch=0,
                grid=(steps,),
                in_specs=[
                    pl.BlockSpec((tile_n, 1), lambda i: (i, 0)),
                    pl.BlockSpec((1, E_pad), lambda i: (0, 0)),
                ],
                out_specs=pl.BlockSpec((tile_n, 2 * E_pad), lambda i: (i, 0)),
            ),
            compiler_params=pltpu.CompilerParams(
                dimension_semantics=("parallel",),
                vmem_limit_bytes=32 << 20,
            ),
            cost_estimate=cost,
        )(x2d, w_row)

        # Un-pad.  Fast path (default E=256): E_pad == E -> a row slice at most.
        if E_pad != E:
            # Single slice+reshape (one pass); callers wanting zero extra HBM
            # traffic can consume the padded (N_pad, 2*E_pad) layout directly.
            out = out[:N].reshape(N, 2, E_pad)[:, :, :E].reshape(N, 2 * E)
        elif N_pad != N:
            out = out[:N]
        return out

    return forward


def gaussian_fourier_projection(x, W, *, out_dtype=None, force_pallas=False,
                                min_pallas_elems=1 << 16):
    """One-shot convenience wrapper (prefer the factory to hoist W prep)."""
    fwd = make_gaussian_fourier_projection(
        W, out_dtype=out_dtype, min_pallas_elems=min_pallas_elems)
    return fwd(x, force_pallas=force_pallas)


# ------------------------------- tests -------------------------------------


def _reference(x, W):
    x_proj = x[:, None] * W[None, :] * 2.0 * np.pi
    return jnp.concatenate([jnp.sin(x_proj), jnp.cos(x_proj)], axis=-1)


if __name__ == "__main__":
    key = jax.random.PRNGKey(0)
    kx, kw, kx2, kw2 = jax.random.split(key, 4)

    # Case 1: module defaults (embedding_size=256, scale=1.0), small batch.
    # Force the Pallas path so the kernel itself is exercised.
    embedding_size, scale, batch = 256, 1.0, 8
    W = jax.random.normal(kw, (embedding_size,), dtype=jnp.float32) * scale
    x = jax.random.uniform(kx, (batch,), dtype=jnp.float32, minval=0.01, maxval=1.0)
    fwd = make_gaussian_fourier_projection(W)
    out = jax.block_until_ready(fwd(x, force_pallas=True))
    assert out.shape == (batch, 2 * embedding_size)
    np.testing.assert_allclose(np.asarray(out), np.asarray(_reference(x, W)),
                               atol=1e-5, rtol=1e-5)

    # Case 1b: same inputs via the tiny-N jnp fallback (auto path).
    out_fb = jax.block_until_ready(fwd(x))
    np.testing.assert_allclose(np.asarray(out_fb), np.asarray(_reference(x, W)),
                               atol=1e-5, rtol=1e-5)

    # Case 2: padding paths (N not a multiple of 8, E not a multiple of 128).
    E2, N2 = 192, 37
    W2 = jax.random.normal(kw2, (E2,), dtype=jnp.float32)
    x2 = jax.random.uniform(kx2, (N2,), dtype=jnp.float32, minval=0.01, maxval=1.0)
    out2 = jax.block_until_ready(
        gaussian_fourier_projection(x2, W2, force_pallas=True))
    assert out2.shape == (N2, 2 * E2)
    np.testing.assert_allclose(np.asarray(out2), np.asarray(_reference(x2, W2)),
                               atol=1e-5, rtol=1e-5)

    print("KERNEL_OK")
</pallas_src>

<mosaic_0001>
module attributes {stable_mosaic.version = 11 : i64} {
  func.func @_gfp_kernel(%arg0: i32, %arg1: memref<8x1xf32, #tpu.memory_space<vmem>>, %arg2: memref<1x256xf32, #tpu.memory_space<vmem>>, %arg3: memref<8x512xf32, #tpu.memory_space<vmem>>) attributes {dimension_semantics = [#tpu.dimension_semantics<parallel>], iteration_bounds = array<i64: 1>, scalar_prefetch = 0 : i64, scratch_operands = 0 : i64, tpu.core_type = #tpu.core_type<tc>, window_params = [{transform_indices = @transform_0, window_bounds = array<i64: 8, 1>}, {pipeline_mode = #tpu.pipeline_mode<synchronous>, transform_indices = @transform_1, window_bounds = array<i64: 1, 256>}, {transform_indices = @transform_2, window_bounds = array<i64: 8, 512>}]} {
    %c0 = arith.constant 0 : index
    %c0_0 = arith.constant 0 : index
    %0 = vector.load %arg1[%c0, %c0_0] : memref<8x1xf32, #tpu.memory_space<vmem>>, vector<8x1xf32>
    %c0_1 = arith.constant 0 : index
    %c0_2 = arith.constant 0 : index
    %1 = vector.load %arg2[%c0_1, %c0_2] : memref<1x256xf32, #tpu.memory_space<vmem>>, vector<1x256xf32>
    %2 = vector.broadcast %0 : vector<8x1xf32> to vector<8x256xf32>
    %3 = vector.broadcast %1 : vector<1x256xf32> to vector<8x256xf32>
    %4 = arith.mulf %2, %3 : vector<8x256xf32>
    %5 = math.sin %4 : vector<8x256xf32>
    %c0_3 = arith.constant 0 : index
    %c0_4 = arith.constant 0 : index
    %6 = vector.load %arg3[%c0_3, %c0_4] : memref<8x512xf32, #tpu.memory_space<vmem>>, vector<8x256xf32>
    tpu.vector_store %arg3[%c0_3, %c0_4], %5 {strides = array<i32>} : memref<8x512xf32, #tpu.memory_space<vmem>>, vector<8x256xf32>,
    %7 = math.cos %4 : vector<8x256xf32>
    %c0_5 = arith.constant 0 : index
    %c256 = arith.constant 256 : index
    %8 = vector.load %arg3[%c0_5, %c256] : memref<8x512xf32, #tpu.memory_space<vmem>>, vector<8x256xf32>
    tpu.vector_store %arg3[%c0_5, %c256], %7 {strides = array<i32>} : memref<8x512xf32, #tpu.memory_space<vmem>>, vector<8x256xf32>,
    return
  }
  func.func @transform_0(%arg0: i32) -> (i32, i32) {
    %c0_i32 = arith.constant 0 : i32
    %c0_i32_0 = arith.constant 0 : i32
    return %arg0, %c0_i32 : i32, i32
  }
  func.func @transform_1(%arg0: i32) -> (i32, i32) {
    %c0_i32 = arith.constant 0 : i32
    %c0_i32_0 = arith.constant 0 : i32
    %c0_i32_1 = arith.constant 0 : i32
    return %c0_i32, %c0_i32_0 : i32, i32
  }
  func.func @transform_2(%arg0: i32) -> (i32, i32) {
    %c0_i32 = arith.constant 0 : i32
    %c0_i32_0 = arith.constant 0 : i32
    return %arg0, %c0_i32 : i32, i32
  }
}

</mosaic_0001>

<bundles_post_ra>
// kernel: tpu_custom_call.1
= control target key start
LH: loop header
LB: loop body
LE: loop exit
PB: predicated region body
PF: predicated region fallthrough
CT: control target
= control target key end

     0   :  { %v529_v1 = vmov 0   ;;  %s632_s0 = inlined_call_operand.vmem [shape: f32[8,1], index: 0, kind: input, shape index: {}]   ;;  %s633_s1 = inlined_call_operand.vmem [shape: f32[1,256], index: 1, kind: input, shape index: {}]   ;;  %s634_s2 = inlined_call_operand.hbm [shape: f32[8,512], index: 2, kind: output, shape index: {}]  }
   0x1   :  { %v12_v0 = vld [vmem:[%s632_s0] sm:$0xff]  ;;  %496 = vset.pattern.permute.xlu0 %v529_v1 }
   0x2   :  { %16 = vperm.xlu0 %496, %v12_v0  }
   0x3   :  { %7 = vsyncpa [#allocation3], 0  ;;  %v20_v2 = vlaneseq  ;;  %v13_v6 = vld [vmem:[%s633_s1] sm:$0x3]  ;;  %v530_v32 = vmov 683565275  }
   0x4   :  { %v531_v36 = vmov 2475754826   ;;  %v532_v38 = vmov 2131351028   ;;  %v533_v40 = vmov 2102212464  }
   0x5   :  { %v21_v3 = vshrl.u32 %v20_v2, 7  ;;  %v534_v42 = vmov 920167782   ;;  %v535_v49 = vmov 1326507024   ;;  %s536_s0 = smov [#allocation2]  }
   0x6   :  { %s456_s1 = sshll.u32 %s536_s0, 4  ;;  %s457_s1 = int_to_ptr.vmem [resolvable:$true] %s456_s1 }
   0x7   :  { %v22_v4 = vsub.s32 0, %v21_v3  ;;  %v26_v5 = vsub.s32 1, %v21_v3  ;;  %s505_s13 = scalar_lea.vmem %s457_s1, 512  ;;  %p510_p1 = scmp.lt.s32.totalorder %s457_s1, %s457_s1 }
   0x8   :  { %p506_p0 = scmp.ne.s32.totalorder %s457_s1, %s505_s13  ;;  %p511_p2 = scmp.lt.s32.totalorder %s505_s13, %s505_s13 }
   0x9   :  { %v23_v7 = vrot.slane %v13_v6, %v22_v4  ;;  %v27_v8 = vrot.slane %v13_v6, %v26_v5 }
   0xa   :  { %p512_p3 = por %p511_p2, %p510_p1 }
   0xc   :  { %p513_p4 = pnand %p512_p3, %p506_p0 }
  0x81   :  { %v17_v9 = vpop.permute.xlu0 %16 }
  0x82   :  { %v558_v10 = vmul.f32 %v23_v7, %v17_v9  ;;  %v560_v11 = vmul.f32 %v27_v8, %v17_v9 }
  0x84   :  { %v32_v12 = vand.u32 2147483647, %v558_v10  ;;  %v35_v13 = vand.u32 2139095040, %v558_v10  ;;  %v139_v14 = vand.u32 2139095040, %v560_v11  ;;  %v136_v17 = vand.u32 2147483647, %v560_v11 }
  0x85   :  { %vm34_vm14 = vcmp.lt.s32.totalorder %v558_v10, 0 }
  0x86   :  { %v36_v15 = vshrl.u32 %v35_v13, 23  ;;  %v39_v16 = vand.u32 8388607, %v32_v12  ;;  %v140_v18 = vshrl.u32 %v139_v14, 23  ;;  %v570_v23 = vand.u32 8388607, %v136_v17 }
  0x87   :  { %vm33_vm15 = vcmp.le.f32.partialorder %v32_v12, 0.7853982 }
  0x88   :  { %v464_v19 = vadd.s32 4294967169, %v36_v15  ;;  %v468_v20 = vadd.s32 4294967169, %v140_v18  ;;  %v40_v22 = vor.u32 8388608, %v39_v16  ;;  %v144_v30 = vor.u32 8388608, %v570_v23 }
  0x8a   :  { %v42_v21 = vadd.s32 1, %v464_v19  ;;  %v146_v24 = vadd.s32 1, %v468_v20  ;;  %v572_v29 = vshll.u32 %v40_v22, 8 }
  0x8c   :  { %vm43_vm0 = vcmp.gt.s32.totalorder %v42_v21, 0  ;;  %vm147_vm1 = vcmp.gt.s32.totalorder %v146_v24, 0 }
  0x8d   :  { %v44_v25 = vsel %vm43_vm0, %v42_v21, 0  ;;  %v148_v28 = vsel %vm147_vm1, %v146_v24, 0  ;;  %v184_v24 = vshll.u32 %v144_v30, 8  ;;  %vm138_vm0 = vcmp.lt.s32.totalorder %v560_v11, 0 }
  0x8e   :  { %v45_v26 = vshrl.u32 %v44_v25, 5  ;;  %v46_v27 = vand.u32 31, %v44_v25  ;;  %v575_v34 = vshrl.u32 %v148_v28, 5  ;;  %v150_v35 = vand.u32 31, %v148_v28 }
  0x8f   :  { %vm137_vm1 = vcmp.le.f32.partialorder %v136_v17, 0.7853982 }
  0x90   :  { %v47_v31 = vsub.s32 32, %v46_v27  ;;  %v49_v33 = vshll.u32 %v530_v32, %v46_v27  ;;  %v52_v37 = vshll.u32 %v531_v36, %v46_v27  ;;  %v55_v39 = vshll.u32 %v532_v38, %v46_v27 }
  0x91   :  { %v58_v41 = vshll.u32 %v533_v40, %v46_v27  ;;  %v61_v43 = vshll.u32 %v534_v42, %v46_v27  ;;  %vm64_vm2 = vcmp.lt.s32.totalorder %v45_v26, 1  ;;  %vm65_vm3 = vcmp.lt.s32.totalorder %v45_v26, 2 }
  0x92   :  { %v50_v44 = vshrl.u32 %v531_v36, %v47_v31  ;;  %v53_v45 = vshrl.u32 %v532_v38, %v47_v31  ;;  %v56_v46 = vshrl.u32 %v533_v40, %v47_v31  ;;  %v48_v47 = vshrl.u32 %v530_v32, %v47_v31 }
  0x93   :  { %v59_v48 = vshrl.u32 %v534_v42, %v47_v31  ;;  %v62_v50 = vshrl.u32 %v535_v49, %v47_v31  ;;  %v151_v54 = vsub.s32 32, %v150_v35  ;;  %vm66_vm4 = vcmp.lt.s32.totalorder %v45_v26, 3 }
  0x94   :  { %v51_v51 = vor.u32 %v50_v44, %v49_v33  ;;  %v54_v52 = vor.u32 %v53_v45, %v52_v37  ;;  %v57_v53 = vor.u32 %v56_v46, %v55_v39  ;;  %vm67_vm5 = vcmp.lt.s32.totalorder %v45_v26, 4 }
  0x95   :  { %v60_v55 = vor.u32 %v59_v48, %v58_v41  ;;  %v63_v56 = vor.u32 %v62_v50, %v61_v43  ;;  %v153_v0 = vshll.u32 %v530_v32, %v150_v35  ;;  %v154_v3 = vshrl.u32 %v531_v36, %v151_v54 }
  0x96   :  { %v68_v57 = vsel %vm64_vm2, %v48_v47, %v51_v51  ;;  %v69_v58 = vsel %vm67_vm5, %v57_v53, 2102212464  ;;  %v72_v59 = vsel %vm64_vm2, %v51_v51, %v54_v52  ;;  %v76_v60 = vsel %vm64_vm2, %v54_v52, %v57_v53 }
  0x97   :  { %v70_v61 = vsel %vm66_vm4, %v54_v52, %v69_v58  ;;  %v73_v62 = vsel %vm67_vm5, %v60_v55, 920167782  ;;  %v77_v63 = vsel %vm67_vm5, %v63_v56, 1326507024  ;;  %v156_v4 = vshll.u32 %v531_v36, %v150_v35 }
  0x98   :  { %v74_v1 = vsel %vm66_vm4, %v57_v53, %v73_v62  ;;  %v78_v2 = vsel %vm66_vm4, %v60_v55, %v77_v63  ;;  %v71_v5 = vsel %vm65_vm3, %v68_v57, %v70_v61  ;;  %v157_v8 = vshrl.u32 %v532_v38, %v151_v54 }
  0x99   :  { %v75_v6 = vsel %vm65_vm3, %v72_v59, %v74_v1  ;;  %v79_v7 = vsel %vm65_vm3, %v76_v60, %v78_v2  ;;  %v155_v16 = vor.u32 %v154_v3, %v153_v0  ;;  %v159_v19 = vshll.u32 %v532_v38, %v150_v35 }
  0x9a   :  { %v584_v9 = vmul.u32.u64.low %v572_v29, %v79_v7  ;;  %v585_v13 = vmul.u32.u64.high %v572_v29, %v79_v7, %v584_v9  ;;  %v588_v14 = vmul.u32.u64.low %v572_v29, %v75_v6  ;;  %v589_v15 = vmul.u32.u64.high %v572_v29, %v75_v6, %v588_v14 }
  0x9b   :  { %v158_v18 = vor.u32 %v157_v8, %v156_v4  ;;  %v160_v20 = vshrl.u32 %v533_v40, %v151_v54  ;;  %v162_v21 = vshll.u32 %v533_v40, %v150_v35  ;;  %v163_v22 = vshrl.u32 %v534_v42, %v151_v54 }
  0x9c   :  { %v166_v23 = vshrl.u32 %v535_v49, %v151_v54  ;;  %v87_v25 = vmul.u32 %v572_v29, %v71_v5  ;;  %v152_v26 = vshrl.u32 %v530_v32, %v151_v54  ;;  %v165_v28 = vshll.u32 %v534_v42, %v150_v35 }
  0x9d   :  { %v161_v27 = vor.u32 %v160_v20, %v159_v19  ;;  %vm89_vm6 = vc.u32 %v585_v13, %v588_v14  ;;  %v90_v31 = vadd.s32 1, %v589_v15  ;;  %v164_v33 = vor.u32 %v163_v22, %v162_v21 }
  0x9e   :  { %vm168_vm7 = vcmp.lt.s32.totalorder %v575_v34, 1  ;;  %v167_v36 = vor.u32 %v166_v23, %v165_v28  ;;  %vm170_vm8 = vcmp.lt.s32.totalorder %v575_v34, 3  ;;  %vm171_vm9 = vcmp.lt.s32.totalorder %v575_v34, 4 }
  0x9f   :  { %v176_v37 = vsel %vm168_vm7, %v155_v16, %v158_v18  ;;  %v91_v30 = vsel %vm89_vm6, %v90_v31, %v589_v15  ;;  %v173_v38 = vsel %vm171_vm9, %v161_v27, 2102212464  ;;  %v177_v29 = vsel %vm171_vm9, %v164_v33, 920167782 }
  0xa0   :  { %v180_v32 = vsel %vm168_vm7, %v158_v18, %v161_v27  ;;  %v92_v39 = vadd.s32 %v91_v30, %v87_v25  ;;  %vm169_vm10 = vcmp.lt.s32.totalorder %v575_v34, 2  ;;  %v178_v35 = vsel %vm170_vm8, %v161_v27, %v177_v29 }
  0xa1   :  { %v181_v40 = vsel %vm171_vm9, %v167_v36, 1326507024  ;;  %v172_v41 = vsel %vm168_vm7, %v152_v26, %v155_v16  ;;  %v174_v42 = vsel %vm170_vm8, %v158_v18, %v173_v38  ;;  %v179_v43 = vsel %vm169_vm10, %v176_v37, %v178_v35 }
  0xa2   :  { %v182_v44 = vsel %vm170_vm8, %v164_v33, %v181_v40  ;;  %v93_v45 = vadd.s32 536870912, %v92_v39  ;;  %v599_v47 = vmul.u32.u64.low %v184_v24, %v179_v43  ;;  %v600_v48 = vmul.u32.u64.high %v184_v24, %v179_v43, %v599_v47 }
  0xa3   :  { %v183_v46 = vsel %vm169_vm10, %v180_v32, %v182_v44  ;;  %v175_v52 = vsel %vm169_vm10, %v172_v41, %v174_v42  ;;  %v88_v4 = vadd.s32 %v588_v14, %v585_v13  ;;  %vm124_vm8 = vweird.f32 %v558_v10 }
  0xa4   :  { %v602_v49 = vmul.u32.u64.low %v184_v24, %v183_v46  ;;  %v603_v50 = vmul.u32.u64.high %v184_v24, %v183_v46, %v602_v49  ;;  %v94_v51 = vshrl.u32 %v93_v45, 30  ;;  %v194_v54 = vadd.s32 1, %v600_v48 }
  0xa5   :  { %v191_v34 = vmul.u32 %v184_v24, %v175_v52 }
  0xa6   :  { %v95_v53 = vshll.u32 %v94_v51, 30  ;;  %vm193_vm11 = vc.u32 %v603_v50, %v599_v47  ;;  %v192_v25 = vadd.s32 %v599_v47, %v603_v50  ;;  %v118_v14 = vsub.s32 4, %v94_v51 }
  0xa7   :  { %v195_v56 = vsel %vm193_vm11, %v194_v54, %v600_v48 }
  0xa8   :  { %v96_v55 = vsub.s32 %v92_v39, %v95_v53  ;;  %v196_v57 = vadd.s32 %v195_v56, %v191_v34  ;;  %v119_v29 = vsel %vm34_vm14, %v118_v14, %v94_v51 }
  0xa9   :  { %v121_v35 = vsel %vm33_vm15, 0, %v119_v29 }
  0xaa   :  { %v98_v58 = vsub.s32 0, %v96_v55  ;;  %v197_v59 = vadd.s32 536870912, %v196_v57  ;;  %v125_v44 = vadd.s32 3, %v121_v35  ;;  %v335_v49 = vand.u32 3, %v121_v35 }
  0xac   :  { %v465_v60 = vmin.u32 %v98_v58, %v96_v55  ;;  %v198_v61 = vshrl.u32 %v197_v59, 30  ;;  %v126_v48 = vand.u32 3, %v125_v44  ;;  %vm337_vm3 = vcmp.eq.s32.totalorder %v335_v49, 0 }
  0xad   :  { %vm340_vm4 = vcmp.eq.s32.totalorder %v335_v49, 2  ;;  %vm336_vm7 = vcmp.lt.s32.totalorder %v335_v49, 2 }
  0xae   :  { %v100_v62 = vclz %v465_v60  ;;  %v199_v63 = vshll.u32 %v198_v61, 30  ;;  %v222_v43 = vsub.s32 4, %v198_v61  ;;  %vm131_vm2 = vcmp.eq.s32.totalorder %v126_v48, 2 }
  0xaf   :  { %vm128_vm5 = vcmp.eq.s32.totalorder %v126_v48, 0  ;;  %vm127_vm6 = vcmp.lt.s32.totalorder %v126_v48, 2 }
  0xb0   :  { %v466_v0 = vadd.s32 4294967294, %v100_v62  ;;  %v200_v1 = vsub.s32 %v196_v57, %v199_v63  ;;  %v223_v46 = vsel %vm138_vm0, %v222_v43, %v198_v61 }
  0xb1   :  { %v225_v51 = vsel %vm137_vm1, 0, %v223_v46 }
  0xb2   :  { %vm467_vm12 = vcmp.lt.s32.totalorder %v466_v0, 0  ;;  %v202_v3 = vsub.s32 0, %v200_v1  ;;  %v438_v63 = vand.u32 3, %v225_v51 }
  0xb3   :  { %v103_v2 = vsel %vm467_vm12, 0, %v466_v0 }
  0xb4   :  { %v104_v5 = vsub.s32 32, %v103_v2  ;;  %v108_v6 = vsub.s32 4294967266, %v103_v2  ;;  %v469_v7 = vmin.u32 %v202_v3, %v200_v1  ;;  %v105_v8 = vshll.u32 %v96_v55, %v103_v2 }
  0xb5   :  { %v229_v55 = vadd.s32 3, %v225_v51  ;;  %vm443_vm10 = vcmp.eq.s32.totalorder %v438_v63, 2  ;;  %vm440_vm12 = vcmp.eq.s32.totalorder %v438_v63, 0 }
  0xb6   :  { %v106_v9 = vshrl.u32 %v88_v4, %v104_v5  ;;  %v109_v15 = vadd.s32 127, %v108_v6  ;;  %v204_v16 = vclz %v469_v7 }
  0xb7   :  { %v230_v62 = vand.u32 3, %v229_v55 }
  0xb8   :  { %v107_v18 = vor.u32 %v106_v9, %v105_v8  ;;  %v110_v19 = vshll.u32 %v109_v15, 23  ;;  %v470_v20 = vadd.s32 4294967294, %v204_v16 }
  0xb9   :  { %vm235_vm9 = vcmp.eq.s32.totalorder %v230_v62, 2  ;;  %vm232_vm11 = vcmp.eq.s32.totalorder %v230_v62, 0 }
  0xba   :  { %v111_v21 = vor.u32 4788187, %v110_v19  ;;  %vm471_vm13 = vcmp.lt.s32.totalorder %v470_v20, 0  ;;  %v114_v23 = vcvt.s32.f32 %v107_v18 }
  0xbb   :  { %v207_v24 = vsel %vm471_vm13, 0, %v470_v20  ;;  %vm231_vm13 = vcmp.lt.s32.totalorder %v230_v62, 2 }
  0xbc   :  { %v112_v22 = vand.u32 2147483647, %v111_v21  ;;  %v208_v26 = vsub.s32 32, %v207_v24  ;;  %v212_v27 = vsub.s32 4294967266, %v207_v24  ;;  %v209_v28 = vshll.u32 %v200_v1, %v207_v24 }
  0xbe   :  { %v115_v13 = vmul.f32 %v114_v23, %v112_v22  ;;  %v210_v31 = vshrl.u32 %v192_v25, %v208_v26  ;;  %v213_v33 = vadd.s32 127, %v212_v27 }
  0xc0   :  { %v116_v36 = vxor.u32 2147483648, %v115_v13  ;;  %v211_v37 = vor.u32 %v210_v31, %v209_v28  ;;  %v214_v30 = vshll.u32 %v213_v33, 23 }
  0xc2   :  { %v117_v38 = vsel %vm34_vm14, %v116_v36, %v115_v13  ;;  %v215_v39 = vor.u32 4788187, %v214_v30  ;;  %v218_v41 = vcvt.s32.f32 %v211_v37  ;;  %vm439_vm14 = vcmp.lt.s32.totalorder %v438_v63, 2 }
  0xc3   :  { %v120_v32 = vsel %vm33_vm15, %v558_v10, %v117_v38  ;;  %vm228_vm15 = vweird.f32 %v560_v11 }
  0xc4   :  { %497 = vcosq.f32 %v120_v32  ;;  %v216_v40 = vand.u32 2147483647, %v215_v39 }
  0xc5   :  { %499 = vsinq.f32 %v120_v32 }
  0xc6   :  { %v219_v42 = vmul.f32 %v218_v41, %v216_v40 }
  0xc8   :  { %v220_v45 = vxor.u32 2147483648, %v219_v42 }
  0xca   :  { %v221_v12 = vsel %vm138_vm0, %v220_v45, %v219_v42 }
  0xcb   :  { %v224_v47 = vsel %vm137_vm1, %v560_v11, %v221_v12 }
  0xcc   :  { %501 = vcosq.f32 %v224_v47 }
  0xcd   :  { %503 = vsinq.f32 %v224_v47 }
  0xce   :  { %v498_v50 = vpop.eup %497 }
  0xcf   :  { %v500_v52 = vpop.eup %499  ;;  %v132_v53 = vxor.u32 2147483648, %v498_v50 }
  0xd0   :  { %v129_v54 = vxor.u32 2147483648, %v500_v52 }
  0xd1   :  { %v133_v34 = vsel %vm131_vm2, %v132_v53, %v500_v52  ;;  %v342_v17 = vsel %vm340_vm4, %v132_v53, %v500_v52 }
  0xd2   :  { %v130_v56 = vsel %vm128_vm5, %v498_v50, %v129_v54  ;;  %v339_v57 = vsel %vm337_vm3, %v498_v50, %v129_v54 }
  0xd3   :  { %v134_v58 = vsel %vm127_vm6, %v130_v56, %v133_v34  ;;  %v343_v59 = vsel %vm336_vm7, %v339_v57, %v342_v17 }
  0xd4   :  { %v135_v60 = vsel %vm124_vm8, nan, %v134_v58  ;;  %v344_v61 = vsel %vm124_vm8, nan, %v343_v59 }
  0xd5   :  { %240 = vst [vmem:[#allocation2] sm:$0xff] %v135_v60  ;;  %448 = vst [vmem:[#allocation2 + $0x10] sm:$0xff] %v344_v61 }
  0xd6   :  { %v502_v0 = vpop.eup %501 }
  0xd7   :  { %v504_v1 = vpop.eup %503  ;;  %v236_v2 = vxor.u32 2147483648, %v502_v0 }
  0xd8   :  { %v233_v3 = vxor.u32 2147483648, %v504_v1 }
  0xd9   :  { %v237_v4 = vsel %vm235_vm9, %v236_v2, %v504_v1  ;;  %v445_v10 = vsel %vm443_vm10, %v236_v2, %v504_v1 }
  0xda   :  { %v234_v5 = vsel %vm232_vm11, %v502_v0, %v233_v3  ;;  %v442_v6 = vsel %vm440_vm12, %v502_v0, %v233_v3 }
  0xdb   :  { %v238_v7 = vsel %vm231_vm13, %v234_v5, %v237_v4  ;;  %v446_v8 = vsel %vm439_vm14, %v442_v6, %v445_v10 }
  0xdc   :  { %v239_v9 = vsel %vm228_vm15, nan, %v238_v7  ;;  %v447_v15 = vsel %vm228_vm15, nan, %v446_v8 }
  0xdd   :  { %241 = vst [vmem:[#allocation2 + $0x8] sm:$0xff] %v239_v9  ;;  %449 = vst [vmem:[#allocation2 + $0x18] sm:$0xff] %v447_v15 }
  0xde   :  { %516 = shalt.err (!%p513_p4)
}
  0xdf   :  { %s517_s16 = scalar_lea.hbm %s634_s2, 512 }
  0xe0   :  { %p518_p5 = scmp.ne.s32.totalorder %s634_s2, %s517_s16  ;;  %p521_p6 = scmp.lt.u32.totalorder %s517_s16, %s634_s2 }
  0xe2   :  { %p523_p7 = pnand %p521_p6, %p518_p5 }
  0xe4   :  { %526 = shalt.err (!%p523_p7)
}
  0xe5   :  { %459 = dma.vmem_to_hbm [thread:$0]  %s457_s1, 512, %s634_s2, [#allocation3]  }
  0xe6   :  { %527 = dma.done.wait [#allocation3], 512  }
  0xe7   :  { %528 = vsyncadd [#allocation3], 4294966784 }
  0xe8   :  { %463 = vsyncpa [#allocation3], 1 }

</bundles_post_ra>
